<compile_context>
chip_gen: v6e
topology: v6e:2x2x1
jax: 0.10.0
libtpu: 0.0.40
codegen_flags: <defaults>
</compile_context>

<pallas_src>
import functools
import math

import jax
import jax.numpy as jnp
from jax.experimental import pallas as pl
from jax.experimental.pallas import tpu as pltpu


# ----------------------------------------------------------------------------
# Generation-aware VMEM budget (v7x: 64 MiB/TC, v5e/v6e: 128 MiB).
# ----------------------------------------------------------------------------
@functools.lru_cache(maxsize=None)
def _vmem_limit_bytes(frac=0.6, fallback=40 * 1024 * 1024):
    try:
        info = pltpu.get_tpu_info()
        cap = getattr(info, "vmem_capacity_bytes", None)
        if cap:
            return int(cap * frac)
    except Exception:
        pass
    return int(fallback)


# ----------------------------------------------------------------------------
# Tile helper: largest divisor of `dim` that is <= cap AND a multiple of
# `align`.  Falls back to the full dimension (always a legal Mosaic block)
# rather than ever returning a misaligned partial tile.
# ----------------------------------------------------------------------------
def _pick_tile(dim, cap, align):
    if dim <= cap:
        return dim
    t = (cap // align) * align
    while t >= align:
        if dim % t == 0:
            return t
        t -= align
    return dim


# ----------------------------------------------------------------------------
# Tiled linear kernel:  y = x @ W + b     (W stored as [in, out])
# ----------------------------------------------------------------------------
def _linear_kernel(x_ref, w_ref, b_ref, o_ref, acc_ref):
    @pl.when(pl.program_id(2) == 0)
    def _init():
        acc_ref[...] = jnp.zeros_like(acc_ref)

    acc_ref[...] += jnp.dot(x_ref[...], w_ref[...],
                            preferred_element_type=jnp.float32)

    @pl.when(pl.program_id(2) == pl.num_programs(2) - 1)
    def _finalize():
        o_ref[...] = (acc_ref[...] + b_ref[...].astype(jnp.float32)).astype(o_ref.dtype)


def linear(x2d, w, b, *, tm_cap=512, tn_cap=512, tk_cap=1024):
    M, K = x2d.shape
    K2, N = w.shape
    assert K == K2
    tm = _pick_tile(M, tm_cap, 8)      # sublane axis of x / out
    tn = _pick_tile(N, tn_cap, 128)    # lane axis of W / out
    tk = _pick_tile(K, tk_cap, 128)    # lane axis of x, sublane axis of W
    grid = (M // tm, N // tn, K // tk)
    return pl.pallas_call(
        _linear_kernel,
        out_shape=jax.ShapeDtypeStruct((M, N), x2d.dtype),
        grid_spec=pltpu.PrefetchScalarGridSpec(
            num_scalar_prefetch=0,
            grid=grid,
            in_specs=[
                pl.BlockSpec((tm, tk), lambda i, j, k: (i, k)),
                pl.BlockSpec((tk, tn), lambda i, j, k: (k, j)),
                pl.BlockSpec((1, tn), lambda i, j, k: (0, j)),
            ],
            out_specs=pl.BlockSpec((tm, tn), lambda i, j, k: (i, j)),
            scratch_shapes=[pltpu.VMEM((tm, tn), jnp.float32)],
        ),
        compiler_params=pltpu.CompilerParams(
            dimension_semantics=("parallel", "parallel", "arbitrary"),
            vmem_limit_bytes=_vmem_limit_bytes(),
        ),
    )(x2d, w, b.reshape(1, N))


# ----------------------------------------------------------------------------
# Fused multi-head attention kernel (optionally with a fused W_out projection).
#   q_ref : (1, tq, D)      — query tile (all heads), W_q already scaled by 1/sqrt(dh)
#   kv_ref: (1, tk, 2*D)    — fused K|V tile (first D cols = K, last D cols = V)
#   o_ref : (1, tq, D)      — lane-dense output tile (heads merged, W_out applied if fused)
# Online-softmax state per head on the LEADING scratch dim (no masked per-step stores).
# ----------------------------------------------------------------------------
def _mha_kernel(*refs, n_heads, fuse_out):
    if fuse_out:
        q_ref, kv_ref, wout_ref, bout_ref, o_ref, m_sc, l_sc, acc_sc, merged_sc = refs
    else:
        q_ref, kv_ref, o_ref, m_sc, l_sc, acc_sc = refs
        wout_ref = bout_ref = merged_sc = None

    kv_step = pl.program_id(2)

    @pl.when(kv_step == 0)
    def _init():
        m_sc[...] = jnp.full_like(m_sc, -jnp.inf)
        l_sc[...] = jnp.zeros_like(l_sc)
        acc_sc[...] = jnp.zeros_like(acc_sc)

    D = q_ref.shape[-1]
    dh = D // n_heads

    for h in range(n_heads):                              # static unroll over heads
        sl = slice(h * dh, (h + 1) * dh)
        q = q_ref[0, :, sl]                               # (tq, dh)
        k = kv_ref[0, :, sl]                              # (tk, dh)  K half
        v = kv_ref[0, :, D + h * dh:D + (h + 1) * dh]     # (tk, dh)  V half

        # q @ k^T by contracting the last dims directly (no XLU transpose).
        # NOTE: the 1/sqrt(dh) softmax scale is folded into W_q / b_q.
        s = jax.lax.dot_general(q, k, (((1,), (1,)), ((), ())),
                                preferred_element_type=jnp.float32)   # (tq, tk)

        m_prev = m_sc[h]                                   # (tq, 1)
        m_new = jnp.maximum(m_prev, jnp.max(s, axis=-1, keepdims=True))
        alpha = jnp.exp(m_prev - m_new)
        p = jnp.exp(s - m_new)                             # (tq, tk)
        l_sc[h] = alpha * l_sc[h] + jnp.sum(p, axis=-1, keepdims=True)
        acc_sc[h] = alpha * acc_sc[h] + jnp.dot(
            p.astype(v.dtype), v, preferred_element_type=jnp.float32)
        m_sc[h] = m_new

    @pl.when(kv_step == pl.num_programs(2) - 1)
    def _finalize():
        for h in range(n_heads):
            sl = slice(h * dh, (h + 1) * dh)
            l = l_sc[h]
            inv = pl.reciprocal(l, approx=True)     # EUP slot (nearly free)
            inv = inv * (2.0 - l * inv)             # one Newton step -> ~f32 accuracy
            head_out = acc_sc[h] * inv              # (tq, dh)
            if fuse_out:
                merged_sc[:, sl] = head_out
            else:
                o_ref[0, :, sl] = head_out.astype(o_ref.dtype)
        if fuse_out:
            # Fused output projection: avoids an extra HBM round trip of (B,Tq,D).
            y = jnp.dot(merged_sc[...], wout_ref[...],
                        preferred_element_type=jnp.float32)
            o_ref[0, :, :] = (y + bout_ref[...].astype(jnp.float32)).astype(o_ref.dtype)


def fused_attention(q, kv, n_heads, w_out=None, b_out=None, *,
                    tq_cap=256, tk_cap=1024):
    B, Tq, D = q.shape
    Tk = kv.shape[1]
    assert kv.shape == (B, Tk, 2 * D)
    assert D % n_heads == 0
    dh = D // n_heads
    fuse_out = w_out is not None

    vmem_limit = _vmem_limit_bytes()
    itemsize = q.dtype.itemsize

    # Budget-aware tiles: double-buffered kv stream <= ~1/4 of VMEM budget,
    # q/out double buffers + f32 scratch <= ~1/2 of VMEM budget.
    kv_row_bytes = 2 * D * itemsize
    tk_cap = max(8, min(tk_cap, (vmem_limit // 4) // max(1, 2 * kv_row_bytes)))
    q_row_bytes = D * itemsize
    tq_cap = max(8, min(tq_cap, (vmem_limit // 2) // max(1, 8 * q_row_bytes)))

    tq = _pick_tile(Tq, tq_cap, 8)
    tk = _pick_tile(Tk, tk_cap, 8)

    # v7x has two TensorCores: keep the parallel grid extent >= 2 when possible.
    if B * (Tq // tq) < 2:
        for cand in range(tq // 2, 7, -1):
            if Tq % cand == 0 and cand % 8 == 0:
                tq = cand
                break

    grid = (B, Tq // tq, Tk // tk)

    in_specs = [
        pl.BlockSpec((1, tq, D), lambda b, qi, ki: (b, qi, 0)),
        pl.BlockSpec((1, tk, 2 * D), lambda b, qi, ki: (b, ki, 0)),
    ]
    scratch = [
        pltpu.VMEM((n_heads, tq, 1), jnp.float32),    # running max per head
        pltpu.VMEM((n_heads, tq, 1), jnp.float32),    # running denom per head
        pltpu.VMEM((n_heads, tq, dh), jnp.float32),   # un-normalized per-head acc
    ]
    args = [q, kv]
    if fuse_out:
        in_specs += [
            pl.BlockSpec((D, D), lambda b, qi, ki: (0, 0)),   # resident W_out
            pl.BlockSpec((1, D), lambda b, qi, ki: (0, 0)),   # resident b_out
        ]
        scratch += [pltpu.VMEM((tq, D), jnp.float32)]         # merged heads buffer
        args += [w_out, b_out.reshape(1, D)]

    kernel = functools.partial(_mha_kernel, n_heads=n_heads, fuse_out=fuse_out)
    return pl.pallas_call(
        kernel,
        out_shape=jax.ShapeDtypeStruct((B, Tq, D), q.dtype),
        grid_spec=pltpu.PrefetchScalarGridSpec(
            num_scalar_prefetch=0,
            grid=grid,
            in_specs=in_specs,
            out_specs=pl.BlockSpec((1, tq, D), lambda b, qi, ki: (b, qi, 0)),
            scratch_shapes=scratch,
        ),
        compiler_params=pltpu.CompilerParams(
            dimension_semantics=("parallel", "parallel", "arbitrary"),
            vmem_limit_bytes=vmem_limit,
        ),
    )(*args)


# ----------------------------------------------------------------------------
# One-time parameter preparation (outside the per-step hot path):
#   * fold 1/sqrt(d_head) into W_q / b_q,
#   * pre-concatenate the fused K|V projection weights/bias.
# ----------------------------------------------------------------------------
def prepare_params(params, n_heads):
    D = params["W_q"].shape[0]
    scale = 1.0 / math.sqrt(D // n_heads)
    prepared = {
        "W_q": params["W_q"] * scale,
        "b_q": params["b_q"] * scale,
        "W_kv": jnp.concatenate([params["W_k"], params["W_v"]], axis=1),   # (D, 2D)
        "b_kv": jnp.concatenate([params["b_k"], params["b_v"]], axis=0),   # (2D,)
    }
    if "W_out" in params:
        prepared["W_out"] = params["W_out"]
        prepared["b_out"] = params["b_out"]
    return prepared


# ----------------------------------------------------------------------------
# Full forward pass.
# ----------------------------------------------------------------------------
def multihead_attention(x_q, x_kv, prepared, n_heads):
    B, Tq, D = x_q.shape
    Tk = x_kv.shape[1]
    assert D % n_heads == 0

    # Q projection (scale already folded into the weights).
    q = linear(x_q.reshape(B * Tq, D), prepared["W_q"], prepared["b_q"]).reshape(B, Tq, D)
    # Fused K|V projection: one pallas_call, one HBM pass over x_kv, 2D-wide output.
    kv = linear(x_kv.reshape(B * Tk, D), prepared["W_kv"],
                prepared["b_kv"]).reshape(B, Tk, 2 * D)

    w_out = prepared.get("W_out")
    b_out = prepared.get("b_out")
    # Fuse W_out into the attention finalize when it comfortably fits in VMEM;
    # otherwise fall back to a separate tiled linear pass.
    fuse_out = (w_out is not None
                and D * D * w_out.dtype.itemsize <= _vmem_limit_bytes() // 4)

    if fuse_out:
        return fused_attention(q, kv, n_heads, w_out=w_out, b_out=b_out)
    out = fused_attention(q, kv, n_heads)
    if w_out is not None:
        out = linear(out.reshape(B * Tq, D), w_out, b_out).reshape(B, Tq, D)
    return out


# ----------------------------------------------------------------------------
# Deterministic parameter initialization (mirrors module __init__).
# ----------------------------------------------------------------------------
def init_params(key, d, n_heads):
    keys = jax.random.split(key, 4)

    def xavier_uniform(k, fan_in, fan_out, gain):
        bound = gain * math.sqrt(6.0 / (fan_in + fan_out))
        return jax.random.uniform(k, (fan_in, fan_out), jnp.float32, -bound, bound)

    gain = 1.0 / math.sqrt(2.0)
    params = {
        "W_q": xavier_uniform(keys[0], d, d, gain), "b_q": jnp.zeros((d,), jnp.float32),
        "W_k": xavier_uniform(keys[1], d, d, gain), "b_k": jnp.zeros((d,), jnp.float32),
        "W_v": xavier_uniform(keys[2], d, d, gain), "b_v": jnp.zeros((d,), jnp.float32),
    }
    if n_heads > 1:
        bound = 1.0 / math.sqrt(d)   # PyTorch Linear default weight init; bias zeroed
        params["W_out"] = jax.random.uniform(keys[3], (d, d), jnp.float32, -bound, bound)
        params["b_out"] = jnp.zeros((d,), jnp.float32)
    return params


# ----------------------------------------------------------------------------
# Pure-JAX reference (correctness check) — uses the ORIGINAL (unfused) params.
# ----------------------------------------------------------------------------
def reference(x_q, x_kv, params, n_heads):
    B, Tq, D = x_q.shape
    Tk = x_kv.shape[1]
    dh = D // n_heads
    q = x_q @ params["W_q"] + params["b_q"]
    k = x_kv @ params["W_k"] + params["b_k"]
    v = x_kv @ params["W_v"] + params["b_v"]
    qh = q.reshape(B, Tq, n_heads, dh).transpose(0, 2, 1, 3)
    kh = k.reshape(B, Tk, n_heads, dh).transpose(0, 2, 1, 3)
    vh = v.reshape(B, Tk, n_heads, dh).transpose(0, 2, 1, 3)
    s = jnp.einsum("bhqd,bhkd->bhqk", qh, kh) / math.sqrt(dh)
    p = jax.nn.softmax(s, axis=-1)
    o = jnp.einsum("bhqk,bhkd->bhqd", p, vh)
    x = o.transpose(0, 2, 1, 3).reshape(B, Tq, D)
    if n_heads > 1:
        x = x @ params["W_out"] + params["b_out"]
    return x


if __name__ == "__main__":
    d = 32
    n_heads = 4
    B, Tq, Tkv = 2, 8, 8

    key = jax.random.PRNGKey(0)
    k_params, k_q, k_kv = jax.random.split(key, 3)
    params = init_params(k_params, d, n_heads)
    prepared = prepare_params(params, n_heads)
    x_q = jax.random.normal(k_q, (B, Tq, d), jnp.float32)
    x_kv = jax.random.normal(k_kv, (B, Tkv, d), jnp.float32)

    out = multihead_attention(x_q, x_kv, prepared, n_heads)
    out = jax.block_until_ready(out)

    ref = reference(x_q, x_kv, params, n_heads)
    assert out.shape == (B, Tq, d)
    # tolerance slightly relaxed vs f32 exact because of the approx-reciprocal
    # (+ Newton step) softmax normalization and the scale-folded W_q
    assert jnp.allclose(out, ref, atol=2e-3, rtol=2e-3), "mismatch vs pure-JAX reference"

    print("KERNEL_OK")
</pallas_src>

<mosaic_0001>
module attributes {stable_mosaic.version = 11 : i64} {
  func.func @_linear_kernel(%arg0: i32, %arg1: i32, %arg2: i32, %arg3: memref<16x32xf32, #tpu.memory_space<vmem>>, %arg4: memref<32x32xf32, #tpu.memory_space<vmem>>, %arg5: memref<1x32xf32, #tpu.memory_space<vmem>>, %arg6: memref<16x32xf32, #tpu.memory_space<vmem>>, %arg7: memref<16x32xf32, #tpu.memory_space<vmem>>) attributes {dimension_semantics = [#tpu.dimension_semantics<parallel>, #tpu.dimension_semantics<parallel>, #tpu.dimension_semantics<arbitrary>], iteration_bounds = array<i64: 1, 1, 1>, scalar_prefetch = 0 : i64, scratch_operands = 1 : i64, tpu.core_type = #tpu.core_type<tc>, window_params = [{transform_indices = @transform_0, window_bounds = array<i64: 16, 32>}, {transform_indices = @transform_1, window_bounds = array<i64: 32, 32>}, {transform_indices = @transform_2, window_bounds = array<i64: 1, 32>}, {transform_indices = @transform_3, window_bounds = array<i64: 16, 32>}]} {
    %c0_i32 = arith.constant 0 : i32
    %0 = arith.cmpi eq, %arg2, %c0_i32 : i32
    %1 = arith.extui %0 : i1 to i32
    %c0_i32_0 = arith.constant 0 : i32
    %2 = arith.cmpi ne, %1, %c0_i32_0 : i32
    scf.if %2 {
      %cst_10 = arith.constant 0.000000e+00 : f32
      %12 = vector.broadcast %cst_10 : f32 to vector<16x32xf32>
      %c0_11 = arith.constant 0 : index
      %c0_12 = arith.constant 0 : index
      %13 = vector.load %arg7[%c0_11, %c0_12] : memref<16x32xf32, #tpu.memory_space<vmem>>, vector<16x32xf32>
      tpu.vector_store %arg7[%c0_11, %c0_12], %12 {strides = array<i32>} : memref<16x32xf32, #tpu.memory_space<vmem>>, vector<16x32xf32>,
    } else {
    }
    %c0 = arith.constant 0 : index
    %c0_1 = arith.constant 0 : index
    %3 = vector.load %arg7[%c0, %c0_1] : memref<16x32xf32, #tpu.memory_space<vmem>>, vector<16x32xf32>
    %c0_2 = arith.constant 0 : index
    %c0_3 = arith.constant 0 : index
    %4 = vector.load %arg3[%c0_2, %c0_3] : memref<16x32xf32, #tpu.memory_space<vmem>>, vector<16x32xf32>
    %c0_4 = arith.constant 0 : index
    %c0_5 = arith.constant 0 : index
    %5 = vector.load %arg4[%c0_4, %c0_5] : memref<32x32xf32, #tpu.memory_space<vmem>>, vector<32x32xf32>
    %cst = arith.constant dense<0.000000e+00> : vector<16x32xf32>
    %6 = tpu.matmul %4, %5, %cst {dimension_numbers = #tpu.dot_dimension_numbers<[1], [0], [0], [1], [0, 0, 1, 1], [], []>} : vector<16x32xf32>, vector<32x32xf32>, vector<16x32xf32> -> vector<16x32xf32>
    %7 = arith.addf %3, %6 : vector<16x32xf32>
    %c0_6 = arith.constant 0 : index
    %c0_7 = arith.constant 0 : index
    %8 = vector.load %arg7[%c0_6, %c0_7] : memref<16x32xf32, #tpu.memory_space<vmem>>, vector<16x32xf32>
    tpu.vector_store %arg7[%c0_6, %c0_7], %7 {strides = array<i32>} : memref<16x32xf32, #tpu.memory_space<vmem>>, vector<16x32xf32>,
    %c0_i32_8 = arith.constant 0 : i32
    %9 = arith.cmpi eq, %arg2, %c0_i32_8 : i32
    %10 = arith.extui %9 : i1 to i32
    %c0_i32_9 = arith.constant 0 : i32
    %11 = arith.cmpi ne, %10, %c0_i32_9 : i32
    scf.if %11 {
      %c0_10 = arith.constant 0 : index
      %c0_11 = arith.constant 0 : index
      %12 = vector.load %arg7[%c0_10, %c0_11] : memref<16x32xf32, #tpu.memory_space<vmem>>, vector<16x32xf32>
      %c0_12 = arith.constant 0 : index
      %c0_13 = arith.constant 0 : index
      %13 = vector.load %arg5[%c0_12, %c0_13] : memref<1x32xf32, #tpu.memory_space<vmem>>, vector<1x32xf32>
      %14 = vector.broadcast %13 : vector<1x32xf32> to vector<16x32xf32>
      %15 = arith.addf %12, %14 : vector<16x32xf32>
      %c0_14 = arith.constant 0 : index
      %c0_15 = arith.constant 0 : index
      %16 = vector.load %arg6[%c0_14, %c0_15] : memref<16x32xf32, #tpu.memory_space<vmem>>, vector<16x32xf32>
      tpu.vector_store %arg6[%c0_14, %c0_15], %15 {strides = array<i32>} : memref<16x32xf32, #tpu.memory_space<vmem>>, vector<16x32xf32>,
    } else {
    }
    return
  }
  func.func @transform_0(%arg0: i32, %arg1: i32, %arg2: i32) -> (i32, i32) {
    %c0_i32 = arith.constant 0 : i32
    return %arg0, %arg2 : i32, i32
  }
  func.func @transform_1(%arg0: i32, %arg1: i32, %arg2: i32) -> (i32, i32) {
    %c0_i32 = arith.constant 0 : i32
    return %arg2, %arg1 : i32, i32
  }
  func.func @transform_2(%arg0: i32, %arg1: i32, %arg2: i32) -> (i32, i32) {
    %c0_i32 = arith.constant 0 : i32
    %c0_i32_0 = arith.constant 0 : i32
    return %c0_i32, %arg1 : i32, i32
  }
  func.func @transform_3(%arg0: i32, %arg1: i32, %arg2: i32) -> (i32, i32) {
    %c0_i32 = arith.constant 0 : i32
    return %arg0, %arg1 : i32, i32
  }
}

</mosaic_0001>

<bundles_post_ra>
// kernel: tpu_custom_call.1
= control target key start
LH: loop header
LB: loop body
LE: loop exit
PB: predicated region body
PF: predicated region fallthrough
CT: control target
= control target key end

     0   :  { %8 = vsyncpa [#allocation4], 0  ;;  %s325_s0 = inlined_call_operand.hbm [shape: f32[16,32], index: 0, kind: input, shape index: {}]   ;;  %s326_s1 = inlined_call_operand.hbm [shape: f32[32,32], index: 1, kind: input, shape index: {}]   ;;  %s327_s2 = inlined_call_operand.vmem [shape: f32[1,32], index: 2, kind: input, shape index: {}]   ;;  %s328_s3 = inlined_call_operand.hbm [shape: f32[16,32], index: 3, kind: output, shape index: {}]  }
   0x1   :  { %9 = vsyncpa [#allocation7], 0 }
   0x2   :  { %10 = vsyncpa [#allocation5], 0  ;;  %s270_s12 = smov [#allocation3]  }
   0x3   :  { %s16_s13 = sshll.u32 %s270_s12, 4  ;;  %s17_s13 = int_to_ptr.vmem [resolvable:$true] %s16_s13 }
   0x4   :  { %s212_s14 = scalar_lea.vmem %s17_s13, 256  ;;  %p217_p1 = scmp.lt.s32.totalorder %s17_s13, %s17_s13 }
   0x5   :  { %p213_p0 = scmp.ne.s32.totalorder %s17_s13, %s212_s14  ;;  %p218_p2 = scmp.lt.s32.totalorder %s212_s14, %s212_s14 }
   0x7   :  { %p219_p3 = por %p218_p2, %p217_p1 }
   0x9   :  { %p220_p4 = pnand %p219_p3, %p213_p0 }
   0xb   :  { %223 = shalt.err (!%p220_p4)
}
   0xc   :  { %s271_s15 = smov 128   ;;  %s272_s16 = smov 8  }
   0xd   :  { %22 = dma.hbm_to_vmem [thread:$0]  %s325_s0, 256, %s17_s13, [#allocation4], %s271_s15, %s271_s15, %s272_s16  }
   0xe   :  { %s273_s19 = smov [#allocation6]  }
   0xf   :  { %s28_s20 = sshll.u32 %s273_s19, 4  ;;  %s29_s20 = int_to_ptr.vmem [resolvable:$true] %s28_s20 }
  0x10   :  { %s232_s21 = scalar_lea.vmem %s29_s20, 512  ;;  %p237_p6 = scmp.lt.s32.totalorder %s29_s20, %s29_s20 }
  0x11   :  { %p233_p5 = scmp.ne.s32.totalorder %s29_s20, %s232_s21  ;;  %p238_p7 = scmp.lt.s32.totalorder %s232_s21, %s232_s21 }
  0x13   :  { %p239_p8 = por %p238_p7, %p237_p6 }
  0x15   :  { %p240_p9 = pnand %p239_p8, %p233_p5 }
  0x17   :  { %243 = shalt.err (!%p240_p9)
}
  0x18   :  { %34 = dma.hbm_to_vmem [thread:$0]  %s326_s1, 512, %s29_s20, [#allocation7], %s271_s15, %s271_s15, %s272_s16  }
  0x19   :  { %264 = dma.done.wait [#allocation4], 256  }
  0x1a   :  { %265 = vsyncadd [#allocation4], 4294967040 }
  0x1b   :  { %266 = dma.done.wait [#allocation7], 512  }
  0x1c   :  { %267 = vsyncadd [#allocation7], 4294966784  ;;  %vm47_vm0 = vcmask 261120   ;;  %v274_v0 = vmov 0.0   ;;  %v57_v1 = vld [vmem:[#allocation6 + $0x18] sm:$0xff]  ;;  %v56_v2 = vld [vmem:[#allocation6 + $0x10] sm:$0xff] }
  0x1d   :  { %49 = vst.msk [vmem:[#allocation2 + $0x8] sm:$0xff] %vm47_vm0, %v274_v0  ;;  %48 = vst.msk [vmem:[#allocation2] sm:$0xff] %vm47_vm0, %v274_v0  ;;  %187 = vmatprep.subr.mxu0 %v57_v1  ;;  %v52_v3 = vld [vmem:[#allocation3] sm:$0xff]  ;;  %v55_v4 = vld [vmem:[#allocation6 + $0x8] sm:$0xff]  ;;  %s275_s24 = smov [#allocation8]  }
  0x1e   :  { %188 = vmatpush3.msra.mxu0 %v57_v1  ;;  %195 = vmatprep.mubr.msk.f32.mxu0 %vm47_vm0, %v52_v3  ;;  %v54_v5 = vld [vmem:[#allocation6] sm:$0xff]  ;;  %v53_v6 = vld [vmem:[#allocation3 + $0x8] sm:$0xff]  ;;  %s165_s25 = sshll.u32 %s275_s24, 4  ;;  %s166_s25 = int_to_ptr.vmem [resolvable:$true] %s165_s25 }
  0x1f   :  { %189 = vmatprep.subr.mxu0 %v56_v2  ;;  %v180_v13 = vld [vmem:[%s327_s2] ss:$0 sm:$0xff]  ;;  %s244_s26 = scalar_lea.vmem %s166_s25, 256  ;;  %p249_p11 = scmp.lt.s32.totalorder %s166_s25, %s166_s25 }
  0x20   :  { %190 = vmatpush3.msra.mxu0 %v56_v2  ;;  %p245_p10 = scmp.ne.s32.totalorder %s166_s25, %s244_s26  ;;  %p250_p12 = scmp.lt.s32.totalorder %s244_s26, %s244_s26 }
  0x21   :  { %191 = vmatprep.subr.mxu0 %v55_v4 }
  0x22   :  { %192 = vmatpush3.msra.mxu0 %v55_v4  ;;  %p251_p13 = por %p250_p12, %p249_p11 }
  0x23   :  { %193 = vmatprep.subr.mxu0 %v54_v5 }
  0x24   :  { %194 = vmatpush3.msra.mxu0 %v54_v5  ;;  %v51_v7 = vld [vmem:[#allocation2 + $0x8] sm:$0xff]  ;;  %v50_v9 = vld [vmem:[#allocation2] sm:$0xff]  ;;  %p252_p0 = pnand %p251_p13, %p245_p10 }
  0x25   :  { %196 = vmatmul.mubr.msk.f32.vlgmr.msra.gmra.mxu0 %vm47_vm0, %v53_v6 }
  0xe5   :  { %v197_v8 = vpop.f32.mrf.mxu0 }
  0xe6   :  { %v141_v10 = vadd.f32 %v197_v8, %v51_v7 }
  0xe7   :  { %v131_v11 = vpop.f32.mrf.mxu0 }
  0xe8   :  { %143 = vst.msk [vmem:[#allocation2 + $0x8] sm:$0xff] %vm47_vm0, %v141_v10  ;;  %v140_v12 = vadd.f32 %v131_v11, %v50_v9 }
  0xea   :  { %142 = vst.msk [vmem:[#allocation2] sm:$0xff] %vm47_vm0, %v140_v12 }
  0xef   :  { %v148_v14 = vld [vmem:[#allocation2 + $0x8] sm:$0xff] }
  0xf0   :  { %v157_v15 = vadd.f32 %v180_v13, %v148_v14 }
  0xf1   :  { %v147_v16 = vld [vmem:[#allocation2] sm:$0xff] }
  0xf2   :  { %v156_v17 = vadd.f32 %v180_v13, %v147_v16  ;;  %159 = vst.msk [vmem:[#allocation8 + $0x8] sm:$0xff] %vm47_vm0, %v157_v15 }
  0xf4   :  { %158 = vst.msk [vmem:[#allocation8] sm:$0xff] %vm47_vm0, %v156_v17 }
  0xf5   :  { %255 = shalt.err (!%p252_p0)
}
  0xf6   :  { %171 = dma.vmem_to_hbm [thread:$0]  %s166_s25, 256, %s328_s3, [#allocation5], %s271_s15, %s271_s15, %s272_s16  }
  0xf7   :  { %268 = dma.done.wait [#allocation5], 256  }
  0xf8   :  { %269 = vsyncadd [#allocation5], 4294967040 }
  0xf9   :  { %175 = vsyncpa [#allocation4], 1 }
  0xfa   :  { %176 = vsyncpa [#allocation7], 1 }
  0xfb   :  { %177 = vsyncpa [#allocation5], 1 }

</bundles_post_ra>
